<compile_context>
chip_gen: v7x
topology: tpu7x:2x2x1
jax: 0.10.0
libtpu: 0.0.40
codegen_flags: <defaults>
</compile_context>

<pallas_src>
import functools

import jax
import jax.numpy as jnp
from jax.experimental import pallas as pl
from jax.experimental.pallas import tpu as pltpu

IN_FEATURES = 1000
OUT_FEATURES = 1
TILE_B_MAX = 1024  # ~4 MiB f32 x-tile; ~8 MiB double-buffered (fits v5e/v6e/v7x scoped VMEM)


def _fc_act_kernel(x_ref, w_ref, b_ref, o_ref, *, act_func):
    # x_ref: (TILE_B, F) VMEM   w_ref: (1, F) VMEM (resident)   b_ref: (1, 1) SMEM
    # o_ref: (TILE_B, 1) VMEM
    x = x_ref[...].astype(jnp.float32)
    w = w_ref[...].astype(jnp.float32)          # hoisted once per grid step; no inner loop
    b = b_ref[0, 0]                             # scalar read via SMEM (frees the vld slot)
    # Linear(1000, 1): y = x @ W^T + b  ==  sum(x * w, axis=-1) + b  (VPU mul + XLU reduce)
    s = jnp.sum(x * w, axis=-1, keepdims=True) + b
    if act_func == "sigmoid":
        y = jax.nn.sigmoid(s)                   # EUP
    elif act_func == "relu":
        y = jnp.maximum(s, 0.0)
    else:  # 'none' (also the in-kernel path for 'softmax'; softmax applied in wrapper)
        y = s
    o_ref[...] = y.astype(o_ref.dtype)


def fc_act_head(x, weight, bias, act_func="sigmoid"):
    """x: [B, 1000] f32, weight: [1, 1000] f32, bias: [1] f32 -> [B, 1] f32."""
    b = x.shape[0]
    # Full-batch tile for small B (single block, full-extent dims are exempt from
    # the (8,128) rule); 1024-row tiles with a real pipelined grid otherwise.
    tile_b = b if b <= TILE_B_MAX else TILE_B_MAX
    grid = (pl.cdiv(b, tile_b),)

    bias2d = bias.reshape(1, 1).astype(jnp.float32)
    in_kernel_act = act_func if act_func in ("sigmoid", "relu") else "none"
    kernel = functools.partial(_fc_act_kernel, act_func=in_kernel_act)

    out = pl.pallas_call(
        kernel,
        out_shape=jax.ShapeDtypeStruct((b, OUT_FEATURES), jnp.float32),
        grid=grid,
        in_specs=[
            # x: tiled over batch, double-buffered by the Pallas pipeline.
            pl.BlockSpec((tile_b, IN_FEATURES), lambda i: (i, 0)),
            # weight: constant block index -> stays resident in VMEM across steps.
            pl.BlockSpec((OUT_FEATURES, IN_FEATURES), lambda i: (0, 0)),
            # bias: single scalar, kept in SMEM (scalar path, no vreg/vld cost).
            pl.BlockSpec(memory_space=pltpu.MemorySpace.SMEM),
        ],
        out_specs=pl.BlockSpec((tile_b, OUT_FEATURES), lambda i: (i, 0)),
        compiler_params=pltpu.CompilerParams(
            # Batch tiles are independent -> megacore sharding on v7x.
            dimension_semantics=("parallel",),
        ),
    )(x, weight, bias2d)

    if act_func == "softmax":
        # nn.Softmax(dim=0): softmax over the batch axis.  Needs the whole batch,
        # so it runs on the tiny [B, 1] result outside the tiled kernel.
        out = jax.nn.softmax(out, axis=0)
    return out


def init_params(key):
    """Deterministic init matching nn.Linear(1000, 1) shapes (uniform ±1/sqrt(fan_in))."""
    kw, kb = jax.random.split(key)
    bound = 1.0 / (IN_FEATURES ** 0.5)
    weight = jax.random.uniform(
        kw, (OUT_FEATURES, IN_FEATURES), jnp.float32, -bound, bound
    )
    bias = jax.random.uniform(kb, (OUT_FEATURES,), jnp.float32, -bound, bound)
    return weight, bias


def _reference(x, weight, bias, act_func):
    s = x @ weight.T + bias
    if act_func == "sigmoid":
        return jax.nn.sigmoid(s)
    if act_func == "relu":
        return jnp.maximum(s, 0.0)
    if act_func == "softmax":
        return jax.nn.softmax(s, axis=0)
    return s


if __name__ == "__main__":
    key = jax.random.PRNGKey(0)
    k_x, k_p, k_x2 = jax.random.split(key, 3)

    weight, bias = init_params(k_p)

    # Small-batch case (module's typical use): B=2.
    batch = 2
    x = jax.random.normal(k_x, (batch, IN_FEATURES), dtype=jnp.float32)
    for act in ("sigmoid", "relu", "softmax", "none"):
        out = jax.block_until_ready(fc_act_head(x, weight, bias, act_func=act))
        ref = _reference(x, weight, bias, act)
        assert out.shape == (batch, OUT_FEATURES)
        assert jnp.allclose(out, ref, atol=1e-5, rtol=1e-5), act

    # Tiled-grid path: B > TILE_B_MAX and not a multiple of the tile (partial edge block).
    batch2 = 2050
    x2 = jax.random.normal(k_x2, (batch2, IN_FEATURES), dtype=jnp.float32)
    out2 = jax.block_until_ready(fc_act_head(x2, weight, bias, act_func="sigmoid"))
    ref2 = _reference(x2, weight, bias, "sigmoid")
    assert out2.shape == (batch2, OUT_FEATURES)
    assert jnp.allclose(out2, ref2, atol=1e-5, rtol=1e-5)

    print("KERNEL_OK")
</pallas_src>

<mosaic_0001>
module attributes {stable_mosaic.version = 11 : i64} {
  func.func @_fc_act_kernel(%arg0: i32, %arg1: memref<2x1000xf32, #tpu.memory_space<vmem>>, %arg2: memref<1x1000xf32, #tpu.memory_space<vmem>>, %arg3: memref<1x1xf32, #tpu.memory_space<smem>>, %arg4: memref<2x1xf32, #tpu.memory_space<vmem>>) attributes {dimension_semantics = [#tpu.dimension_semantics<parallel>], iteration_bounds = array<i64: 1>, scalar_prefetch = 0 : i64, scratch_operands = 0 : i64, tpu.core_type = #tpu.core_type<tc>, window_params = [{transform_indices = @transform_0, window_bounds = array<i64: 2, 1000>}, {pipeline_mode = #tpu.pipeline_mode<synchronous>, transform_indices = @transform_1, window_bounds = array<i64: 1, 1000>}, {transform_indices = @transform_2, window_bounds = array<i64: 1, 1>}, {transform_indices = @transform_3, window_bounds = array<i64: 2, 1>}]} {
    %c0 = arith.constant 0 : index
    %c0_0 = arith.constant 0 : index
    %0 = vector.load %arg1[%c0, %c0_0] : memref<2x1000xf32, #tpu.memory_space<vmem>>, vector<2x1000xf32>
    %c0_1 = arith.constant 0 : index
    %c0_2 = arith.constant 0 : index
    %1 = vector.load %arg2[%c0_1, %c0_2] : memref<1x1000xf32, #tpu.memory_space<vmem>>, vector<1x1000xf32>
    %c0_3 = arith.constant 0 : index
    %c0_4 = arith.constant 0 : index
    %2 = memref.load %arg3[%c0_3, %c0_4] : memref<1x1xf32, #tpu.memory_space<smem>>
    %3 = vector.broadcast %1 : vector<1x1000xf32> to vector<2x1000xf32>
    %4 = arith.mulf %0, %3 : vector<2x1000xf32>
    %cst = arith.constant dense<0.000000e+00> : vector<2xf32>
    %5 = vector.multi_reduction <add>, %4, %cst [1] : vector<2x1000xf32> to vector<2xf32>
    %6 = vector.shape_cast %5 : vector<2xf32> to vector<2x1xf32>
    %7 = vector.broadcast %2 : f32 to vector<2x1xf32>
    %8 = arith.addf %6, %7 : vector<2x1xf32>
    %9 = arith.negf %8 : vector<2x1xf32>
    %10 = math.exp %9 : vector<2x1xf32>
    %cst_5 = arith.constant 1.000000e+00 : f32
    %11 = vector.broadcast %cst_5 : f32 to vector<2x1xf32>
    %12 = arith.addf %11, %10 : vector<2x1xf32>
    %13 = arith.divf %11, %12 : vector<2x1xf32>
    %c0_6 = arith.constant 0 : index
    %c0_7 = arith.constant 0 : index
    %14 = vector.load %arg4[%c0_6, %c0_7] : memref<2x1xf32, #tpu.memory_space<vmem>>, vector<2x1xf32>
    tpu.vector_store %arg4[%c0_6, %c0_7], %13 {strides = array<i32>} : memref<2x1xf32, #tpu.memory_space<vmem>>, vector<2x1xf32>,
    return
  }
  func.func @transform_0(%arg0: i32) -> (i32, i32) {
    %c0_i32 = arith.constant 0 : i32
    %c0_i32_0 = arith.constant 0 : i32
    return %arg0, %c0_i32 : i32, i32
  }
  func.func @transform_1(%arg0: i32) -> (i32, i32) {
    %c0_i32 = arith.constant 0 : i32
    %c0_i32_0 = arith.constant 0 : i32
    %c0_i32_1 = arith.constant 0 : i32
    return %c0_i32, %c0_i32_0 : i32, i32
  }
  func.func @transform_2(%arg0: i32) -> (i32, i32) {
    %c0_i32 = arith.constant 0 : i32
    %c0_i32_0 = arith.constant 0 : i32
    %c0_i32_1 = arith.constant 0 : i32
    return %c0_i32, %c0_i32_0 : i32, i32
  }
  func.func @transform_3(%arg0: i32) -> (i32, i32) {
    %c0_i32 = arith.constant 0 : i32
    %c0_i32_0 = arith.constant 0 : i32
    return %arg0, %c0_i32 : i32, i32
  }
}

</mosaic_0001>

<bundles_post_ra>
// kernel: tpu_custom_call.1
= control target key start
LH: loop header
LB: loop body
LE: loop exit
PB: predicated region body
PF: predicated region fallthrough
CT: control target
= control target key end

     0   :  { %9 = vsyncpa [#allocation4], 0  ;;  %s309_s0 = inlined_call_operand.hbm [shape: f32[2,1000], index: 0, kind: input, shape index: {}]   ;;  %s310_s1 = inlined_call_operand.hbm [shape: f32[1,1000], index: 1, kind: input, shape index: {}]   ;;  %s311_s2 = inlined_call_operand.<no memory space> [shape: f32[1,1], index: 2, kind: input, shape index: {}]   ;;  %s312_s3 = inlined_call_operand.vmem [shape: f32[2,1], index: 3, kind: output, shape index: {}]  }
   0x1   :  { %10 = vsyncpa [#allocation6], 0  ;;  %s249_s12 = smov [#allocation3]   ;;  %s250_s14 = smov [#allocation5]  }
   0x2   :  { %s17_s13 = sshll.u32 %s249_s12, 4  ;;  %s27_s15 = sshll.u32 %s250_s14, 4  ;;  %s18_s13 = int_to_ptr.vmem [resolvable:$true] %s17_s13  ;;  %s28_s15 = int_to_ptr.vmem [resolvable:$true] %s27_s15 }
   0x3   :  { %s201_s18 = scalar_lea.hbm %s309_s0, 256 }
   0x4   :  { %p202_p0 = scmp.ne.s32.totalorder %s309_s0, %s201_s18  ;;  %p205_p1 = scmp.lt.u32.totalorder %s201_s18, %s309_s0 }
   0x6   :  { %p207_p2 = pnand %p205_p1, %p202_p0 }
   0x8   :  { %210 = shalt.err (!%p207_p2)
}
   0x9   :  { %s211_s23 = scalar_lea.vmem %s18_s13, 256  ;;  %p216_p4 = scmp.lt.s32.totalorder %s18_s13, %s18_s13 }
   0xa   :  { %p212_p3 = scmp.ne.s32.totalorder %s18_s13, %s211_s23  ;;  %p217_p5 = scmp.lt.s32.totalorder %s211_s23, %s211_s23 }
   0xc   :  { %p218_p6 = por %p217_p5, %p216_p4 }
   0xe   :  { %p219_p7 = pnand %p218_p6, %p212_p3 }
  0x10   :  { %222 = shalt.err (!%p219_p7)
}
  0x11   :  { %20 = dma.hbm_to_vmem [thread:$0]  %s309_s0, 256, %s18_s13, [#allocation4]  }
  0x12   :  { %s223_s28 = scalar_lea.hbm %s310_s1, 128 }
  0x13   :  { %p224_p8 = scmp.ne.s32.totalorder %s310_s1, %s223_s28  ;;  %p227_p9 = scmp.lt.u32.totalorder %s223_s28, %s310_s1 }
  0x15   :  { %p229_p10 = pnand %p227_p9, %p224_p8 }
  0x17   :  { %232 = shalt.err (!%p229_p10)
}
  0x18   :  { %s233_s6 = scalar_lea.vmem %s28_s15, 128  ;;  %p238_p12 = scmp.lt.s32.totalorder %s28_s15, %s28_s15 }
  0x19   :  { %p234_p11 = scmp.ne.s32.totalorder %s28_s15, %s233_s6  ;;  %p239_p13 = scmp.lt.s32.totalorder %s233_s6, %s233_s6 }
  0x1b   :  { %p240_p0 = por %p239_p13, %p238_p12 }
  0x1d   :  { %p241_p1 = pnand %p240_p0, %p234_p11 }
  0x1f   :  { %244 = shalt.err (!%p241_p1)
}
  0x20   :  { %30 = dma.hbm_to_vmem [thread:$0]  %s310_s1, 128, %s28_s15, [#allocation6]  }
  0x21   :  { %245 = dma.done.wait [#allocation4], 256  }
  0x22   :  { %246 = vsyncadd [#allocation4], 4294967040 }
  0x23   :  { %247 = dma.done.wait [#allocation6], 128  }
  0x24   :  { %248 = vsyncadd [#allocation6], 4294967168  ;;  %v44_v0 = vlaneseq  ;;  %v251_v1 = vmov 1983009808   ;;  %v41_v13 = vld [vmem:[#allocation5] sm:$0xff]  ;;  %v39_v29 = vld [vmem:[#allocation3] sm:$0xff]  ;;  %v177_v62 = vstv %s311_s2 }
  0x25   :  { %v79_v2 = vunpack.c.l.s4 %v251_v1  ;;  %v40_v32 = vld [vmem:[#allocation3 + $0x8] sm:$0xff]  ;;  %vm158_vm0 = vcmask 1041408   ;;  %vm172_vm1 = vcmask 844800   ;;  %vm185_vm2 = vcmask 1024  }
  0x26   :  { %v45_v3 = vshrl.u32 %v44_v0, 7 }
  0x27   :  { %v80_v4 = vunpack.c.0.s8 %v79_v2 }
  0x28   :  { %v46_v5 = vsub.s32 0, %v45_v3  ;;  %v50_v6 = vsub.s32 1, %v45_v3  ;;  %v54_v7 = vsub.s32 2, %v45_v3  ;;  %v58_v8 = vsub.s32 3, %v45_v3 }
  0x29   :  { %v62_v9 = vsub.s32 4, %v45_v3  ;;  %v66_v10 = vsub.s32 5, %v45_v3  ;;  %v70_v11 = vsub.s32 6, %v45_v3  ;;  %v74_v12 = vsub.s32 7, %v45_v3 }
  0x2a   :  { %v83_v14 = vsub.s32 %v80_v4, %v45_v3  ;;  %v47_v15 = vrot.slane %v41_v13, %v46_v5  ;;  %v51_v16 = vrot.slane %v41_v13, %v50_v6  ;;  %v55_v17 = vrot.slane %v41_v13, %v54_v7 }
  0x2b   :  { %v59_v18 = vrot.slane %v41_v13, %v58_v8  ;;  %v63_v19 = vrot.slane %v41_v13, %v62_v9  ;;  %v67_v20 = vrot.slane %v41_v13, %v66_v10  ;;  %v71_v21 = vrot.slane %v41_v13, %v70_v11 }
  0x2c   :  { %v75_v22 = vrot.slane %v41_v13, %v74_v12  ;;  %v76_v23 = vcombine.low %v47_v15, %v51_v16 }
  0x2d   :  { %v77_v24 = vcombine.low %v55_v17, %v59_v18  ;;  %v93_v25 = vcombine.low %v63_v19, %v67_v20 }
  0x2e   :  { %v94_v26 = vcombine.low %v71_v21, %v75_v22  ;;  %v84_v27 = vrot.slane %v76_v23, %v83_v14 }
  0x2f   :  { %v91_v28 = vrot.slane %v77_v24, %v83_v14  ;;  %v101_v30 = vrot.slane %v93_v25, %v83_v14 }
  0x30   :  { %v108_v31 = vrot.slane %v94_v26, %v83_v14 }
  0x31   :  { %v92_v33 = vcombine.low %v84_v27, %v91_v28 }
  0x32   :  { %v109_v34 = vcombine.low %v101_v30, %v108_v31 }
  0x33   :  { %v112_v35 = vmul.f32 %v92_v33, %v39_v29 }
  0x34   :  { %v113_v36 = vmul.f32 %v109_v34, %v40_v32 }
  0x35   :  { %v116_v37 = vcombine.high %v112_v35, %v112_v35  ;;  %v123_v38 = vrot.slane %v112_v35, %v83_v14 }
  0x36   :  { %v133_v39 = vcombine.high %v113_v36, %v113_v36  ;;  %v140_v42 = vrot.slane %v113_v36, %v83_v14 }
  0x37   :  { %v130_v40 = vrot.slane %v116_v37, %v83_v14  ;;  %v131_v41 = vcombine.high %v123_v38, %v123_v38  ;;  %v159_v43 = vsel %vm158_vm0, %v123_v38, 0.0 }
  0x38   :  { %v147_v48 = vrot.slane %v133_v39, %v83_v14  ;;  %v148_v49 = vcombine.high %v140_v42, %v140_v42  ;;  %v166_v52 = vsel %vm158_vm0, %v140_v42, 0.0 }
  0x39   :  { %v132_v44 = vcombine.high %v130_v40, %v130_v40  ;;  %v160_v45 = vsel %vm158_vm0, %v131_v41, 0.0  ;;  %v162_v46 = vsel %vm158_vm0, %v130_v40, 0.0 }
  0x3a   :  { %v161_v47 = vadd.f32 %v160_v45, %v159_v43  ;;  %v149_v54 = vcombine.high %v147_v48, %v147_v48  ;;  %v168_v55 = vsel %vm158_vm0, %v148_v49, 0.0  ;;  %v170_v57 = vsel %vm158_vm0, %v147_v48, 0.0 }
  0x3b   :  { %v164_v50 = vsel %vm158_vm0, %v132_v44, 0.0 }
  0x3c   :  { %v163_v51 = vadd.f32 %v162_v46, %v161_v47  ;;  %v173_v59 = vsel %vm172_vm1, %v149_v54, 0.0 }
  0x3e   :  { %v165_v53 = vadd.f32 %v164_v50, %v163_v51 }
  0x40   :  { %v167_v56 = vadd.f32 %v166_v52, %v165_v53 }
  0x42   :  { %v169_v58 = vadd.f32 %v168_v55, %v167_v56 }
  0x44   :  { %v171_v60 = vadd.f32 %v170_v57, %v169_v58 }
  0x46   :  { %v174_v61 = vadd.f32 %v173_v59, %v171_v60 }
  0x48   :  { %175 = vadd.xlane.f32.xlu0 %v174_v61 }
  0xd5   :  { %v176_v63 = vpop.xlane.xlu0 %175 }
  0xd6   :  { %v178_v0 = vadd.f32 %v177_v62, %v176_v63 }
  0xd8   :  { %v193_v1 = vmul.f32 -1.442695, %v178_v0 }
  0xda   :  { %197 = vpow2.f32 %v193_v1 }
  0xe4   :  { %v198_v2 = vpop.eup %197 }
  0xe5   :  { %v182_v3 = vadd.f32 1.0, %v198_v2 }
  0xe7   :  { %199 = vrcp.f32 %v182_v3 }
  0xf1   :  { %v200_v4 = vpop.eup %199 }
  0xf2   :  { %186 = vst.msk [vmem:[%s312_s3] sm:$0x3] %vm185_vm2, %v200_v4 }
  0xf3   :  { %191 = vsyncpa [#allocation4], 1 }
  0xf4   :  { %192 = vsyncpa [#allocation6], 1 }

</bundles_post_ra>
